<compile_context>
chip_gen: v7x
topology: tpu7x:2x2x1
jax: 0.10.0
libtpu: 0.0.40
codegen_flags: <defaults>
</compile_context>

<pallas_src>
import functools

import jax
import jax.numpy as jnp
from jax.experimental import pallas as pl
from jax.experimental.pallas import tpu as pltpu


def proxy_anchor_kernel(emb_hbm_ref, labels_ref, prox_ref, out_ref,
                        e_n_ref, acc_ref, dma_sem, *,
                        margin, alpha, num_classes, tiles_per_core,
                        needs_mask, use_bf16_matmul):
    core = pl.program_id(0)
    t = pl.program_id(1)
    last = pl.num_programs(1) - 1

    @pl.when(t == 0)
    def _init():
        # One-shot DMA of the (padded) embeddings HBM -> VMEM scratch, then
        # L2-normalize in place: x * rsqrt(max(sum(x^2), 1e-24))
        # == F.normalize(x, p=2, dim=1).
        cp = pltpu.make_async_copy(emb_hbm_ref, e_n_ref, dma_sem.at[0])
        cp.start()
        cp.wait()
        e = e_n_ref[...]
        ssq = jnp.sum(e * e, axis=1, keepdims=True)
        e_n_ref[...] = e * jax.lax.rsqrt(jnp.maximum(ssq, 1e-24))
        acc_ref[0] = 0.0   # sum_c log1p(pos_sum[c])   (this core's classes)
        acc_ref[1] = 0.0   # sum_c log1p(neg_sum[c])
        acc_ref[2] = 0.0   # number of distinct labels present (this core)

    e_n = e_n_ref[...]                                            # (B, D)

    # Normalize the current proxy tile (rows independent -> per-tile exact).
    p = prox_ref[...].astype(jnp.float32)                         # (Cb, D)
    pssq = jnp.sum(p * p, axis=1, keepdims=True)
    p_n = p * jax.lax.rsqrt(jnp.maximum(pssq, 1e-24))

    if use_bf16_matmul:
        lhs = e_n.astype(jnp.bfloat16)
        rhs = p_n.astype(jnp.bfloat16)
    else:
        lhs, rhs = e_n, p_n
    # (B, D) x (Cb, D) contracted on D -> (B, Cb); no transposed proxy copy.
    sim = jax.lax.dot_general(lhs, rhs, (((1,), (1,)), ((), ())),
                              preferred_element_type=jnp.float32)

    b, cb = sim.shape
    tile = core * tiles_per_core + t
    cls_ids = jax.lax.broadcasted_iota(jnp.int32, (b, cb), 1) + tile * cb
    labels = labels_ref[...]                                      # (B, 1)
    pos_mask = cls_ids == labels                                  # (B, Cb)

    # Single fused exp: pos arg = -alpha*(sim - margin), neg arg = alpha*(sim + margin).
    coef = jnp.where(pos_mask, -alpha, alpha)
    tval = jnp.exp(coef * sim + alpha * margin)
    if needs_mask:
        # Padded tail classes / padded batch rows contribute exactly 0.
        valid = (cls_ids < num_classes) & (labels >= 0)
        tval = jnp.where(valid, tval, 0.0)
    pos_term = jnp.where(pos_mask, tval, 0.0)
    neg_term = tval - pos_term

    pos_sum = jnp.sum(pos_term, axis=0, keepdims=True)            # (1, Cb)
    neg_sum = jnp.sum(neg_term, axis=0, keepdims=True)            # (1, Cb)
    present = jnp.max(pos_mask.astype(jnp.float32), axis=0, keepdims=True)

    acc_ref[0] = acc_ref[0] + jnp.sum(jnp.log1p(pos_sum))
    acc_ref[1] = acc_ref[1] + jnp.sum(jnp.log1p(neg_sum))
    acc_ref[2] = acc_ref[2] + jnp.sum(present)   # each class in exactly one tile

    @pl.when(t == last)
    def _finalize():
        # Lane-dense (1, 8, 128) partial row: lane 0 = pos, 1 = neg, 2 = present.
        lane = jax.lax.broadcasted_iota(jnp.int32, (1, 8, 128), 2)
        vals = jnp.where(lane == 0, acc_ref[0],
               jnp.where(lane == 1, acc_ref[1],
               jnp.where(lane == 2, acc_ref[2], 0.0)))
        out_ref[...] = vals


def _round_up(x, m):
    return ((x + m - 1) // m) * m


def _vmem_capacity_bytes():
    try:
        return int(pltpu.get_tpu_info().vmem_capacity_bytes)
    except Exception:
        return 64 * 1024 * 1024   # conservative fallback (v7x physical VMEM)


def _pick_class_block(num_classes, b_pad, d_pad, vmem_capacity):
    """Largest lane-dense (multiple-of-128) class tile that fits the VMEM budget."""
    target = 1024 if vmem_capacity >= (96 << 20) else 512   # v5e/v6e vs v7x
    budget = int(0.55 * vmem_capacity)                      # headroom for compiler
    resident = 4 * b_pad * d_pad + (64 << 10)               # e_n scratch + misc
    best = 128
    cb = 128
    while cb <= target:
        need = resident + 2 * 4 * cb * d_pad + 8 * 4 * b_pad * cb
        if need <= budget:
            best = cb
        cb += 128
    return min(best, _round_up(num_classes, 128))


def proxy_anchor_loss(embeddings, labels, proxies, *, margin=0.1, alpha=32,
                      class_block=None, use_bf16_matmul=False,
                      proxy_buffer_count=None):
    B, D = embeddings.shape
    C, D2 = proxies.shape
    assert D == D2

    b_pad = _round_up(max(B, 8), 8)
    d_pad = _round_up(max(D, 128), 128)
    capacity = _vmem_capacity_bytes()
    if class_block is None:
        class_block = _pick_class_block(C, b_pad, d_pad, capacity)
    assert class_block % 128 == 0, class_block

    num_tiles = -(-C // class_block)
    splits = 2 if num_tiles >= 2 else 1        # shard class axis over v7x's 2 TCs
    tiles_per_core = -(-num_tiles // splits)
    c_total = splits * tiles_per_core * class_block
    needs_mask = (c_total != C) or (b_pad != B)

    # Zero-padding is norm- and dot-preserving; padded rows get label -1 and
    # padded classes are masked in-kernel.
    emb = jnp.zeros((b_pad, d_pad), jnp.float32).at[:B, :D].set(
        embeddings.astype(jnp.float32))
    prox = jnp.zeros((c_total, d_pad), jnp.float32).at[:C, :D].set(
        proxies.astype(jnp.float32))
    lab = jnp.full((b_pad, 1), -1, jnp.int32).at[:B, 0].set(
        labels.astype(jnp.int32))

    kernel = functools.partial(
        proxy_anchor_kernel, margin=float(margin), alpha=float(alpha),
        num_classes=C, tiles_per_core=tiles_per_core,
        needs_mask=needs_mask, use_bf16_matmul=use_bf16_matmul)

    prox_spec_kwargs = {}
    if proxy_buffer_count is not None:
        prox_spec_kwargs["pipeline_mode"] = pl.Buffered(proxy_buffer_count)

    est = (4 * b_pad * d_pad                    # e_n scratch (single copy)
           + 2 * 4 * class_block * d_pad        # streamed proxy double buffer
           + 8 * 4 * b_pad * class_block        # (B, Cb) f32 work tiles
           + 4 * splits * 8 * 128 + (64 << 10))
    vmem_limit = int(min(int(0.9 * capacity), max(32 << 20, 2 * est)))
    vmem_limit = max(vmem_limit, est)

    grid_spec = pltpu.PrefetchScalarGridSpec(
        num_scalar_prefetch=0,
        grid=(splits, tiles_per_core),
        in_specs=[
            # Embeddings stay in HBM; one manual DMA per core at step 0
            # (no pointless double-buffer for a resident operand).
            pl.BlockSpec(memory_space=pl.ANY),
            pl.BlockSpec((b_pad, 1), lambda core, t: (0, 0)),       # labels
            pl.BlockSpec((class_block, d_pad),                      # proxies
                         lambda core, t: (core * tiles_per_core + t, 0),
                         **prox_spec_kwargs),
        ],
        out_specs=pl.BlockSpec((1, 8, 128), lambda core, t: (core, 0, 0)),
        scratch_shapes=[
            pltpu.VMEM((b_pad, d_pad), jnp.float32),   # normalized embeddings
            pltpu.SMEM((3,), jnp.float32),             # per-core partial sums
            pltpu.SemaphoreType.DMA((1,)),             # embeddings DMA
        ],
    )

    partials = pl.pallas_call(
        kernel,
        grid_spec=grid_spec,
        out_shape=jax.ShapeDtypeStruct((splits, 8, 128), jnp.float32),
        compiler_params=pltpu.CompilerParams(
            dimension_semantics=("parallel", "arbitrary"),
            vmem_limit_bytes=vmem_limit,
        ),
        cost_estimate=pl.CostEstimate(
            flops=2 * b_pad * c_total * d_pad,
            transcendentals=b_pad * c_total + b_pad + c_total,
            bytes_accessed=4 * (b_pad * d_pad + c_total * d_pad + b_pad
                                + splits * 8 * 128),
        ),
    )(emb, lab, prox)

    pos_log = jnp.sum(partials[:, 0, 0])
    neg_log = jnp.sum(partials[:, 0, 1])
    present = jnp.sum(partials[:, 0, 2])
    return pos_log / present + neg_log / float(C)


def reference_loss(embeddings, labels, proxies, *, margin=0.1, alpha=32):
    # Pure-JAX reference mirroring the PyTorch forward.
    C = proxies.shape[0]
    e = embeddings / jnp.maximum(
        jnp.linalg.norm(embeddings, axis=1, keepdims=True), 1e-12)
    p = proxies / jnp.maximum(
        jnp.linalg.norm(proxies, axis=1, keepdims=True), 1e-12)
    sim = e @ p.T
    onehot = jax.nn.one_hot(labels, C, dtype=jnp.float32)
    pos = jnp.exp(-alpha * (sim - margin)) * onehot
    neg = jnp.exp(alpha * (sim + margin)) * (1.0 - onehot)
    present = jnp.sum((jnp.sum(onehot, axis=0) > 0).astype(jnp.float32))
    pos_loss = jnp.sum(jnp.log1p(jnp.sum(pos, axis=0))) / present
    neg_loss = jnp.sum(jnp.log1p(jnp.sum(neg, axis=0))) / C
    return pos_loss + neg_loss


if __name__ == "__main__":
    margin, alpha = 0.1, 32

    # --- Test 1: module's nominal shapes (C=16, D=32, B=8) -----------------
    num_classes, embedding_size, batch = 16, 32, 8
    key = jax.random.PRNGKey(0)
    k_prox, k_emb, k_lab = jax.random.split(key, 3)
    # nn.Parameter(torch.randn(C, D)) + kaiming_normal_(mode='fan_out')
    # -> std = sqrt(2 / num_classes)
    proxies = jax.random.normal(k_prox, (num_classes, embedding_size),
                                dtype=jnp.float32) * jnp.sqrt(2.0 / num_classes)
    embeddings = jax.random.normal(k_emb, (batch, embedding_size),
                                   dtype=jnp.float32)
    labels = jax.random.randint(k_lab, (batch,), 0, num_classes, dtype=jnp.int32)

    ref1 = reference_loss(embeddings, labels, proxies, margin=margin, alpha=alpha)
    out1 = proxy_anchor_loss(embeddings, labels, proxies, margin=margin, alpha=alpha)
    jax.block_until_ready(out1)
    assert jnp.allclose(out1, ref1, rtol=1e-3, atol=1e-3), (out1, ref1)

    # --- Test 2: ragged C/B/D, forced small tile -> multi-tile grid, two-core
    #     class split, tail/row masking all exercised ------------------------
    C2, D2, B2 = 300, 48, 12
    k2a, k2b, k2c = jax.random.split(jax.random.PRNGKey(0), 3)
    proxies2 = jax.random.normal(k2a, (C2, D2), jnp.float32) * jnp.sqrt(2.0 / C2)
    emb2 = jax.random.normal(k2b, (B2, D2), jnp.float32)
    lab2 = jax.random.randint(k2c, (B2,), 0, C2, dtype=jnp.int32)
    ref2 = reference_loss(emb2, lab2, proxies2, margin=margin, alpha=alpha)
    out2 = proxy_anchor_loss(emb2, lab2, proxies2, margin=margin, alpha=alpha,
                             class_block=128)
    jax.block_until_ready(out2)
    assert jnp.allclose(out2, ref2, rtol=1e-3, atol=1e-3), (out2, ref2)

    # --- Test 3: bf16 MXU-operand fast path (v6e/v7x); alpha=32 amplifies
    #     bf16 sim error through exp, so use a realistic loose tolerance -----
    out3 = proxy_anchor_loss(embeddings, labels, proxies, margin=margin,
                             alpha=alpha, use_bf16_matmul=True)
    jax.block_until_ready(out3)
    assert jnp.allclose(out3, ref1, rtol=5e-2, atol=5e-1), (out3, ref1)

    print("KERNEL_OK")
</pallas_src>

<mosaic_0001>
module attributes {stable_mosaic.version = 11 : i64} {
  func.func @proxy_anchor_kernel(%arg0: i32, %arg1: i32, %arg2: memref<8x128xf32, #tpu.memory_space<any>>, %arg3: memref<8x1xi32, #tpu.memory_space<vmem>>, %arg4: memref<128x128xf32, #tpu.memory_space<vmem>>, %arg5: memref<1x8x128xf32, #tpu.memory_space<vmem>>, %arg6: memref<8x128xf32, #tpu.memory_space<vmem>>, %arg7: memref<3xf32, #tpu.memory_space<smem>>, %arg8: memref<1x!tpu.dma_semaphore, #tpu.memory_space<semaphore_mem>>) attributes {dimension_semantics = [#tpu.dimension_semantics<parallel>, #tpu.dimension_semantics<arbitrary>], iteration_bounds = array<i64: 1, 1>, scalar_prefetch = 0 : i64, scratch_operands = 3 : i64, tpu.core_type = #tpu.core_type<tc>, window_params = [{}, {pipeline_mode = #tpu.pipeline_mode<synchronous>, transform_indices = @transform_1, window_bounds = array<i64: 8, 1>}, {transform_indices = @transform_2, window_bounds = array<i64: 128, 128>}, {transform_indices = @transform_3, window_bounds = array<i64: 1, 8, 128>}]} {
    %c0_i32 = arith.constant 0 : i32
    %0 = arith.cmpi eq, %arg1, %c0_i32 : i32
    %1 = arith.extui %0 : i1 to i32
    %c0_i32_0 = arith.constant 0 : i32
    %2 = arith.cmpi ne, %1, %c0_i32_0 : i32
    scf.if %2 {
      %c0_i32_26 = arith.constant 0 : i32
      %75 = tpu.memref_slice %arg8[%c0_i32_26] : memref<1x!tpu.dma_semaphore, #tpu.memory_space<semaphore_mem>> -> memref<1x!tpu.dma_semaphore, #tpu.memory_space<semaphore_mem>>
      %76 = tpu.memref_squeeze %75 : memref<1x!tpu.dma_semaphore, #tpu.memory_space<semaphore_mem>> -> memref<!tpu.dma_semaphore, #tpu.memory_space<semaphore_mem>>
      tpu.enqueue_dma source(%arg2 : memref<8x128xf32, #tpu.memory_space<any>>) target(%arg6 : memref<8x128xf32, #tpu.memory_space<vmem>>) target_semaphore(%76 : memref<!tpu.dma_semaphore, #tpu.memory_space<semaphore_mem>>)
      %c0_i32_27 = arith.constant 0 : i32
      %77 = tpu.memref_slice %arg8[%c0_i32_27] : memref<1x!tpu.dma_semaphore, #tpu.memory_space<semaphore_mem>> -> memref<1x!tpu.dma_semaphore, #tpu.memory_space<semaphore_mem>>
      %78 = tpu.memref_squeeze %77 : memref<1x!tpu.dma_semaphore, #tpu.memory_space<semaphore_mem>> -> memref<!tpu.dma_semaphore, #tpu.memory_space<semaphore_mem>>
      tpu.wait_dma2 semaphore(%78 : memref<!tpu.dma_semaphore, #tpu.memory_space<semaphore_mem>>) src(%arg2 : memref<8x128xf32, #tpu.memory_space<any>>) dst(%arg6 : memref<8x128xf32, #tpu.memory_space<vmem>>)
      %c0_28 = arith.constant 0 : index
      %c0_29 = arith.constant 0 : index
      %79 = vector.load %arg6[%c0_28, %c0_29] : memref<8x128xf32, #tpu.memory_space<vmem>>, vector<8x128xf32>
      %80 = arith.mulf %79, %79 : vector<8x128xf32>
      %cst_30 = arith.constant dense<0.000000e+00> : vector<8xf32>
      %81 = vector.multi_reduction <add>, %80, %cst_30 [1] : vector<8x128xf32> to vector<8xf32>
      %82 = vector.shape_cast %81 : vector<8xf32> to vector<8x1xf32>
      %cst_31 = arith.constant 1.000000e-24 : f32
      %83 = vector.broadcast %cst_31 : f32 to vector<8x1xf32>
      %84 = arith.maximumf %82, %83 : vector<8x1xf32>
      %85 = math.rsqrt %84 : vector<8x1xf32>
      %86 = vector.broadcast %85 : vector<8x1xf32> to vector<8x128xf32>
      %87 = arith.mulf %79, %86 : vector<8x128xf32>
      %c0_32 = arith.constant 0 : index
      %c0_33 = arith.constant 0 : index
      %88 = vector.load %arg6[%c0_32, %c0_33] : memref<8x128xf32, #tpu.memory_space<vmem>>, vector<8x128xf32>
      tpu.vector_store %arg6[%c0_32, %c0_33], %87 {strides = array<i32>} : memref<8x128xf32, #tpu.memory_space<vmem>>, vector<8x128xf32>,
      %cst_34 = arith.constant 0.000000e+00 : f32
      %c0_35 = arith.constant 0 : index
      %89 = memref.load %arg7[%c0_35] : memref<3xf32, #tpu.memory_space<smem>>
      memref.store %cst_34, %arg7[%c0_35] : memref<3xf32, #tpu.memory_space<smem>>
      %cst_36 = arith.constant 0.000000e+00 : f32
      %c1_37 = arith.constant 1 : index
      %90 = memref.load %arg7[%c1_37] : memref<3xf32, #tpu.memory_space<smem>>
      memref.store %cst_36, %arg7[%c1_37] : memref<3xf32, #tpu.memory_space<smem>>
      %cst_38 = arith.constant 0.000000e+00 : f32
      %c2_39 = arith.constant 2 : index
      %91 = memref.load %arg7[%c2_39] : memref<3xf32, #tpu.memory_space<smem>>
      memref.store %cst_38, %arg7[%c2_39] : memref<3xf32, #tpu.memory_space<smem>>
    } else {
    }
    %c0 = arith.constant 0 : index
    %c0_1 = arith.constant 0 : index
    %3 = vector.load %arg6[%c0, %c0_1] : memref<8x128xf32, #tpu.memory_space<vmem>>, vector<8x128xf32>
    %c0_2 = arith.constant 0 : index
    %c0_3 = arith.constant 0 : index
    %4 = vector.load %arg4[%c0_2, %c0_3] : memref<128x128xf32, #tpu.memory_space<vmem>>, vector<128x128xf32>
    %5 = arith.mulf %4, %4 : vector<128x128xf32>
    %cst = arith.constant dense<0.000000e+00> : vector<128xf32>
    %6 = vector.multi_reduction <add>, %5, %cst [1] : vector<128x128xf32> to vector<128xf32>
    %7 = vector.shape_cast %6 : vector<128xf32> to vector<128x1xf32>
    %cst_4 = arith.constant 1.000000e-24 : f32
    %8 = vector.broadcast %cst_4 : f32 to vector<128x1xf32>
    %9 = arith.maximumf %7, %8 : vector<128x1xf32>
    %10 = math.rsqrt %9 : vector<128x1xf32>
    %11 = vector.broadcast %10 : vector<128x1xf32> to vector<128x128xf32>
    %12 = arith.mulf %4, %11 : vector<128x128xf32>
    %cst_5 = arith.constant dense<0.000000e+00> : vector<8x128xf32>
    %13 = tpu.matmul %3, %12, %cst_5 {dimension_numbers = #tpu.dot_dimension_numbers<[1], [1], [0], [0], [0, 0, 1, 0], [], []>} : vector<8x128xf32>, vector<128x128xf32>, vector<8x128xf32> -> vector<8x128xf32>
    %c1_i32 = arith.constant 1 : i32
    %14 = arith.muli %arg0, %c1_i32 : i32
    %15 = arith.addi %14, %arg1 : i32
    %16 = tpu.iota {dimensions = array<i32: 1>} : vector<8x128xi32>
    %c128_i32 = arith.constant 128 : i32
    %17 = arith.muli %15, %c128_i32 : i32
    %18 = vector.broadcast %17 : i32 to vector<8x128xi32>
    %19 = arith.addi %16, %18 : vector<8x128xi32>
    %c0_6 = arith.constant 0 : index
    %c0_7 = arith.constant 0 : index
    %20 = vector.load %arg3[%c0_6, %c0_7] : memref<8x1xi32, #tpu.memory_space<vmem>>, vector<8x1xi32>
    %21 = vector.broadcast %20 : vector<8x1xi32> to vector<8x128xi32>
    %22 = arith.cmpi eq, %19, %21 : vector<8x128xi32>
    %cst_8 = arith.constant -3.200000e+01 : f32
    %cst_9 = arith.constant 3.200000e+01 : f32
    %23 = vector.broadcast %cst_8 : f32 to vector<8x128xf32>
    %24 = vector.broadcast %cst_9 : f32 to vector<8x128xf32>
    %25 = arith.select %22, %23, %24 : vector<8x128xi1>, vector<8x128xf32>
    %26 = arith.mulf %25, %13 : vector<8x128xf32>
    %cst_10 = arith.constant 3.200000e+00 : f32
    %27 = vector.broadcast %cst_10 : f32 to vector<8x128xf32>
    %28 = arith.addf %26, %27 : vector<8x128xf32>
    %29 = math.exp %28 : vector<8x128xf32>
    %c16_i32 = arith.constant 16 : i32
    %30 = vector.broadcast %c16_i32 : i32 to vector<8x128xi32>
    %31 = arith.cmpi slt, %19, %30 : vector<8x128xi32>
    %c0_i32_11 = arith.constant 0 : i32
    %32 = vector.broadcast %c0_i32_11 : i32 to vector<8x1xi32>
    %33 = arith.cmpi sge, %20, %32 : vector<8x1xi32>
    %34 = vector.broadcast %33 : vector<8x1xi1> to vector<8x128xi1>
    %35 = arith.andi %31, %34 : vector<8x128xi1>
    %cst_12 = arith.constant 0.000000e+00 : f32
    %36 = vector.broadcast %cst_12 : f32 to vector<8x128xf32>
    %37 = arith.select %35, %29, %36 : vector<8x128xi1>, vector<8x128xf32>
    %cst_13 = arith.constant 0.000000e+00 : f32
    %38 = vector.broadcast %cst_13 : f32 to vector<8x128xf32>
    %39 = arith.select %22, %37, %38 : vector<8x128xi1>, vector<8x128xf32>
    %40 = arith.subf %37, %39 : vector<8x128xf32>
    %cst_14 = arith.constant dense<0.000000e+00> : vector<128xf32>
    %41 = vector.multi_reduction <add>, %39, %cst_14 [0] : vector<8x128xf32> to vector<128xf32>
    %42 = vector.shape_cast %41 : vector<128xf32> to vector<1x128xf32>
    %cst_15 = arith.constant dense<0.000000e+00> : vector<128xf32>
    %43 = vector.multi_reduction <add>, %40, %cst_15 [0] : vector<8x128xf32> to vector<128xf32>
    %44 = vector.shape_cast %43 : vector<128xf32> to vector<1x128xf32>
    %45 = arith.extui %22 : vector<8x128xi1> to vector<8x128xi32>
    %46 = arith.sitofp %45 : vector<8x128xi32> to vector<8x128xf32>
    %cst_16 = arith.constant dense<0xFF800000> : vector<128xf32>
    %47 = vector.multi_reduction <maximumf>, %46, %cst_16 [0] : vector<8x128xf32> to vector<128xf32>
    %48 = vector.shape_cast %47 : vector<128xf32> to vector<1x128xf32>
    %c0_17 = arith.constant 0 : index
    %49 = memref.load %arg7[%c0_17] : memref<3xf32, #tpu.memory_space<smem>>
    %50 = math.log1p %42 : vector<1x128xf32>
    %51 = vector.shape_cast %50 : vector<1x128xf32> to vector<1x1x128xf32>
    %cst_18 = arith.constant dense<0.000000e+00> : vector<1xf32>
    %52 = vector.multi_reduction <add>, %51, %cst_18 [1, 2] : vector<1x1x128xf32> to vector<1xf32>
    %53 = vector.shape_cast %52 : vector<1xf32> to vector<1x1x1xf32>
    %54 = vector.extract %53[0, 0, 0] : f32 from vector<1x1x1xf32>
    %55 = arith.addf %49, %54 : f32
    %c0_19 = arith.constant 0 : index
    %56 = memref.load %arg7[%c0_19] : memref<3xf32, #tpu.memory_space<smem>>
    memref.store %55, %arg7[%c0_19] : memref<3xf32, #tpu.memory_space<smem>>
    %c1 = arith.constant 1 : index
    %57 = memref.load %arg7[%c1] : memref<3xf32, #tpu.memory_space<smem>>
    %58 = math.log1p %44 : vector<1x128xf32>
    %59 = vector.shape_cast %58 : vector<1x128xf32> to vector<1x1x128xf32>
    %cst_20 = arith.constant dense<0.000000e+00> : vector<1xf32>
    %60 = vector.multi_reduction <add>, %59, %cst_20 [1, 2] : vector<1x1x128xf32> to vector<1xf32>
    %61 = vector.shape_cast %60 : vector<1xf32> to vector<1x1x1xf32>
    %62 = vector.extract %61[0, 0, 0] : f32 from vector<1x1x1xf32>
    %63 = arith.addf %57, %62 : f32
    %c1_21 = arith.constant 1 : index
    %64 = memref.load %arg7[%c1_21] : memref<3xf32, #tpu.memory_space<smem>>
    memref.store %63, %arg7[%c1_21] : memref<3xf32, #tpu.memory_space<smem>>
    %c2 = arith.constant 2 : index
    %65 = memref.load %arg7[%c2] : memref<3xf32, #tpu.memory_space<smem>>
    %66 = vector.shape_cast %48 : vector<1x128xf32> to vector<1x1x128xf32>
    %cst_22 = arith.constant dense<0.000000e+00> : vector<1xf32>
    %67 = vector.multi_reduction <add>, %66, %cst_22 [1, 2] : vector<1x1x128xf32> to vector<1xf32>
    %68 = vector.shape_cast %67 : vector<1xf32> to vector<1x1x1xf32>
    %69 = vector.extract %68[0, 0, 0] : f32 from vector<1x1x1xf32>
    %70 = arith.addf %65, %69 : f32
    %c2_23 = arith.constant 2 : index
    %71 = memref.load %arg7[%c2_23] : memref<3xf32, #tpu.memory_space<smem>>
    memref.store %70, %arg7[%c2_23] : memref<3xf32, #tpu.memory_space<smem>>
    %c0_i32_24 = arith.constant 0 : i32
    %72 = arith.cmpi eq, %arg1, %c0_i32_24 : i32
    %73 = arith.extui %72 : i1 to i32
    %c0_i32_25 = arith.constant 0 : i32
    %74 = arith.cmpi ne, %73, %c0_i32_25 : i32
    scf.if %74 {
      %75 = tpu.iota {dimensions = array<i32: 2>} : vector<1x8x128xi32>
      %c0_i32_26 = arith.constant 0 : i32
      %76 = vector.broadcast %c0_i32_26 : i32 to vector<1x8x128xi32>
      %77 = arith.cmpi eq, %75, %76 : vector<1x8x128xi32>
      %c0_27 = arith.constant 0 : index
      %78 = memref.load %arg7[%c0_27] : memref<3xf32, #tpu.memory_space<smem>>
      %c1_i32_28 = arith.constant 1 : i32
      %79 = vector.broadcast %c1_i32_28 : i32 to vector<1x8x128xi32>
      %80 = arith.cmpi eq, %75, %79 : vector<1x8x128xi32>
      %c1_29 = arith.constant 1 : index
      %81 = memref.load %arg7[%c1_29] : memref<3xf32, #tpu.memory_space<smem>>
      %c2_i32 = arith.constant 2 : i32
      %82 = vector.broadcast %c2_i32 : i32 to vector<1x8x128xi32>
      %83 = arith.cmpi eq, %75, %82 : vector<1x8x128xi32>
      %c2_30 = arith.constant 2 : index
      %84 = memref.load %arg7[%c2_30] : memref<3xf32, #tpu.memory_space<smem>>
      %cst_31 = arith.constant 0.000000e+00 : f32
      %85 = vector.broadcast %84 : f32 to vector<1x8x128xf32>
      %86 = vector.broadcast %cst_31 : f32 to vector<1x8x128xf32>
      %87 = arith.select %83, %85, %86 : vector<1x8x128xi1>, vector<1x8x128xf32>
      %88 = vector.broadcast %81 : f32 to vector<1x8x128xf32>
      %89 = arith.select %80, %88, %87 : vector<1x8x128xi1>, vector<1x8x128xf32>
      %90 = vector.broadcast %78 : f32 to vector<1x8x128xf32>
      %91 = arith.select %77, %90, %89 : vector<1x8x128xi1>, vector<1x8x128xf32>
      %c0_32 = arith.constant 0 : index
      %c0_33 = arith.constant 0 : index
      %c0_34 = arith.constant 0 : index
      %92 = vector.load %arg5[%c0_32, %c0_33, %c0_34] : memref<1x8x128xf32, #tpu.memory_space<vmem>>, vector<1x8x128xf32>
      tpu.vector_store %arg5[%c0_32, %c0_33, %c0_34], %91 {strides = array<i32>} : memref<1x8x128xf32, #tpu.memory_space<vmem>>, vector<1x8x128xf32>,
    } else {
    }
    return
  }
  func.func @transform_1(%arg0: i32, %arg1: i32) -> (i32, i32) {
    %c0_i32 = arith.constant 0 : i32
    %c0_i32_0 = arith.constant 0 : i32
    %c0_i32_1 = arith.constant 0 : i32
    return %c0_i32, %c0_i32_0 : i32, i32
  }
  func.func @transform_2(%arg0: i32, %arg1: i32) -> (i32, i32) {
    %c1_i32 = arith.constant 1 : i32
    %0 = arith.muli %arg0, %c1_i32 : i32
    %1 = arith.addi %0, %arg1 : i32
    %c0_i32 = arith.constant 0 : i32
    %c0_i32_0 = arith.constant 0 : i32
    return %1, %c0_i32 : i32, i32
  }
  func.func @transform_3(%arg0: i32, %arg1: i32) -> (i32, i32, i32) {
    %c0_i32 = arith.constant 0 : i32
    %c0_i32_0 = arith.constant 0 : i32
    %c0_i32_1 = arith.constant 0 : i32
    return %arg0, %c0_i32, %c0_i32_0 : i32, i32, i32
  }
}

</mosaic_0001>

<bundles_post_ra>
// kernel: tpu_custom_call.1
= control target key start
LH: loop header
LB: loop body
LE: loop exit
PB: predicated region body
PF: predicated region fallthrough
CT: control target
= control target key end

     0   :  { %8 = vsyncpa [#allocation6], 0  ;;  %s788_s0 = inlined_call_operand.vmem [shape: f32[8,128], index: 0, kind: input, shape index: {}]   ;;  %s789_s1 = inlined_call_operand.vmem [shape: s32[8,1], index: 1, kind: input, shape index: {}]   ;;  %s790_s2 = inlined_call_operand.hbm [shape: f32[128,128], index: 2, kind: input, shape index: {}]   ;;  %s791_s3 = inlined_call_operand.hbm [shape: f32[1,8,128], index: 3, kind: output, shape index: {}]  }
   0x1   :  { %9 = vsyncpa [#allocation7], 0  ;;  %s621_s12 = smov [#allocation5]   ;;  %s571_s16 = scalar_lea.hbm %s790_s2, 2048 }
   0x2   :  { %s21_s13 = sshll.u32 %s621_s12, 4  ;;  %p572_p0 = scmp.ne.s32.totalorder %s790_s2, %s571_s16  ;;  %s22_s13 = int_to_ptr.vmem [resolvable:$true] %s21_s13 }
   0x3   :  { %p575_p1 = scmp.lt.u32.totalorder %s571_s16, %s790_s2 }
   0x5   :  { %p577_p2 = pnand %p575_p1, %p572_p0 }
   0x7   :  { %580 = shalt.err (!%p577_p2)
}
   0x8   :  { %s581_s21 = scalar_lea.vmem %s22_s13, 2048  ;;  %p586_p4 = scmp.lt.s32.totalorder %s22_s13, %s22_s13 }
   0x9   :  { %p582_p3 = scmp.ne.s32.totalorder %s22_s13, %s581_s21  ;;  %p587_p5 = scmp.lt.s32.totalorder %s581_s21, %s581_s21 }
   0xb   :  { %p588_p6 = por %p587_p5, %p586_p4 }
   0xd   :  { %p589_p7 = pnand %p588_p6, %p582_p3 }
   0xf   :  { %592 = shalt.err (!%p589_p7)
}
  0x10   :  { %s622_s22 = smov 128   ;;  %s623_s23 = smov 8  }
  0x11   :  { %27 = dma.hbm_to_vmem [thread:$0]  %s790_s2, 2048, %s22_s13, [#allocation6], %s622_s22, %s622_s22, %s623_s23  }
  0x12   :  { %615 = dma.done.wait [#allocation6], 2048  }
  0x13   :  { %616 = vsyncadd [#allocation6], 4294965248  ;;  %v665_v0 = vld [vmem:[%s788_s0] sm:$0xff] }
  0x14   :  { %78 = vsyncadd [#allocation4], 128 }
  0x15   :  { %617 = dma.done.wait [#allocation4], 128 }
  0x16   :  { %618 = vsyncadd [#allocation4], 4294967168  ;;  %v667_v1 = vld [vmem:[#allocation5] sm:$0xff]  ;;  %v669_v2 = vld [vmem:[#allocation5 + $0x10] sm:$0xff]  ;;  %v624_v33 = vmov 0.0|0.0   ;;  %v83_v34 = vmul.f32 %v665_v0, %v665_v0  ;;  %vm625_vm0 = vmmov 0  }
  0x17   :  { %v671_v3 = vld [vmem:[#allocation5 + $0x8] sm:$0xff]  ;;  %v113_v4 = vmul.f32 %v667_v1, %v667_v1  ;;  %v115_v5 = vmul.f32 %v669_v2, %v669_v2  ;;  %v677_v6 = vld [vmem:[#allocation5 + $0x18] sm:$0xff]  ;;  %v685_v10 = vld [vmem:[#allocation5 + $0x20] sm:$0xff]  ;;  %490 = vmatprep.subr.bf16.mxu0 %v624_v33  ;;  %v626_v35 = vmov 0.0   ;;  %v627_v37 = vmov 0   ;;  %s629_s30 = smov [#allocation8]  }
  0x18   :  { %v114_v7 = vmul.f32 %v671_v3, %v671_v3  ;;  %v116_v8 = vmul.f32 %v677_v6, %v677_v6  ;;  %v683_v9 = vld [vmem:[#allocation5 + $0x28] sm:$0xff]  ;;  %v117_v12 = vmul.f32 %v685_v10, %v685_v10  ;;  %v691_v13 = vld [vmem:[#allocation5 + $0x38] sm:$0xff]  ;;  %v693_v14 = vld [vmem:[#allocation5 + $0x30] sm:$0xff]  ;;  %487 = vmatprep.mubr.msk.f32.mxu0 %vm625_vm0, %v626_v35  ;;  %529 = vset.pattern.permute.xlu1 %v627_v37  ;;  %vm336_vm7 = vcmask 1040384   ;;  %s409_s4 = sshll.u32 %s629_s30, 4  ;;  %s410_s4 = int_to_ptr.vmem [resolvable:$true] %s409_s4 }
  0x19   :  { %129 = vadd.xlane.f32.xlu0 %v113_v4  ;;  %133 = vadd.xlane.f32.xlu1 %v115_v5  ;;  %v118_v11 = vmul.f32 %v683_v9, %v683_v9  ;;  %v120_v15 = vmul.f32 %v691_v13, %v691_v13  ;;  %v119_v16 = vmul.f32 %v693_v14, %v693_v14  ;;  %v699_v17 = vld [vmem:[#allocation5 + $0x48] sm:$0xff]  ;;  %v701_v18 = vld [vmem:[#allocation5 + $0x40] sm:$0xff]  ;;  %v707_v21 = vld [vmem:[#allocation5 + $0x58] sm:$0xff]  ;;  %s593_s5 = scalar_lea.vmem %s410_s4, 128  ;;  %p598_p9 = scmp.lt.s32.totalorder %s410_s4, %s410_s4 }
  0x1a   :  { %v122_v19 = vmul.f32 %v699_v17, %v699_v17  ;;  %v121_v20 = vmul.f32 %v701_v18, %v701_v18  ;;  %v709_v22 = vld [vmem:[#allocation5 + $0x50] sm:$0xff]  ;;  %v124_v23 = vmul.f32 %v707_v21, %v707_v21  ;;  %v715_v25 = vld [vmem:[#allocation5 + $0x68] sm:$0xff]  ;;  %v717_v26 = vld [vmem:[#allocation5 + $0x60] sm:$0xff]  ;;  %530 = vset.pattern.permute.xlu0 %v627_v37  ;;  %p594_p8 = scmp.ne.s32.totalorder %s410_s4, %s593_s5  ;;  %p599_p10 = scmp.lt.s32.totalorder %s593_s5, %s593_s5 }
  0x1b   :  { %v123_v24 = vmul.f32 %v709_v22, %v709_v22  ;;  %v126_v27 = vmul.f32 %v715_v25, %v715_v25  ;;  %v125_v28 = vmul.f32 %v717_v26, %v717_v26  ;;  %v723_v29 = vld [vmem:[#allocation5 + $0x78] sm:$0xff]  ;;  %v725_v30 = vld [vmem:[#allocation5 + $0x70] sm:$0xff]  ;;  %v285_v36 = vld [vmem:[%s789_s1] sm:$0xff] }
  0x1c   :  { %v128_v31 = vmul.f32 %v723_v29, %v723_v29  ;;  %v127_v32 = vmul.f32 %v725_v30, %v725_v30  ;;  %vm296_vm1 = vcmp.ge.s32.totalorder %v285_v36, 0  ;;  %p600_p11 = por %p599_p10, %p598_p9 }
  0x1d   :  { %131 = vadd.xlane.f32.xlu0 %v114_v7  ;;  %135 = vadd.xlane.f32.xlu1 %v116_v8  ;;  %v297_v38 = vsel %vm296_vm1, 1, %v627_v37 }
  0x1e   :  { %p601_p12 = pnand %p600_p11, %p594_p8 }
  0x21   :  { %139 = vadd.xlane.f32.xlu1 %v118_v11  ;;  %137 = vadd.xlane.f32.xlu0 %v117_v12 }
  0x25   :  { %143 = vadd.xlane.f32.xlu1 %v120_v15  ;;  %141 = vadd.xlane.f32.xlu0 %v119_v16 }
  0x29   :  { %147 = vadd.xlane.f32.xlu1 %v122_v19  ;;  %145 = vadd.xlane.f32.xlu0 %v121_v20 }
  0x2d   :  { %151 = vadd.xlane.f32.xlu1 %v124_v23  ;;  %149 = vadd.xlane.f32.xlu0 %v123_v24 }
  0x31   :  { %155 = vadd.xlane.f32.xlu1 %v126_v27  ;;  %153 = vadd.xlane.f32.xlu0 %v125_v28 }
  0x35   :  { %159 = vadd.xlane.f32.xlu1 %v128_v31  ;;  %157 = vadd.xlane.f32.xlu0 %v127_v32 }
  0x39   :  { %84 = vadd.xlane.f32.xlu0 %v83_v34 }
  0x46   :  { %287 = vperm.xlu1 %529, %v285_v36  }
  0x4f   :  { %299 = vperm.xlu0 %530, %v297_v38  }
  0xa6   :  { %v130_v39 = vpop.xlane.xlu0 %129  ;;  %v134_v40 = vpop.xlane.xlu1 %133 }
  0xa7   :  { %v161_v41 = vmax.f32 %v130_v39, 1e-24  ;;  %v163_v45 = vmax.f32 %v134_v40, 1e-24 }
  0xa9   :  { %531 = vrsqrt.f32 %v161_v41 }
  0xaa   :  { %v132_v42 = vpop.xlane.xlu0 %131  ;;  %v136_v43 = vpop.xlane.xlu1 %135 }
  0xab   :  { %v162_v44 = vmax.f32 %v132_v42, 1e-24  ;;  %v164_v46 = vmax.f32 %v136_v43, 1e-24 }
  0xad   :  { %533 = vrsqrt.f32 %v162_v44 }
  0xae   :  { %v140_v47 = vpop.xlane.xlu1 %139  ;;  %535 = vrsqrt.f32 %v163_v45  ;;  %v138_v48 = vpop.xlane.xlu0 %137 }
  0xaf   :  { %537 = vrsqrt.f32 %v164_v46  ;;  %v166_v49 = vmax.f32 %v140_v47, 1e-24  ;;  %v165_v50 = vmax.f32 %v138_v48, 1e-24 }
  0xb1   :  { %539 = vrsqrt.f32 %v166_v49 }
  0xb2   :  { %541 = vrsqrt.f32 %v165_v50  ;;  %v144_v53 = vpop.xlane.xlu1 %143  ;;  %v142_v56 = vpop.xlane.xlu0 %141 }
  0xb3   :  { %v532_v51 = vpop.eup %531  ;;  %v168_v59 = vmax.f32 %v144_v53, 1e-24  ;;  %v167_v61 = vmax.f32 %v142_v56, 1e-24 }
  0xb4   :  { %v193_v54 = vmul.f32 %v532_v51, %v667_v1 }
  0xb5   :  { %543 = vrsqrt.f32 %v168_v59  ;;  %v628_v59 = vmov 32.0  }
  0xb6   :  { %545 = vrsqrt.f32 %v167_v61  ;;  %v148_v4 = vpop.xlane.xlu1 %147  ;;  %v146_v1 = vpop.xlane.xlu0 %145 }
  0xb7   :  { %v534_v52 = vpop.eup %533  ;;  %v170_v8 = vmax.f32 %v148_v4, 1e-24  ;;  %v169_v11 = vmax.f32 %v146_v1, 1e-24 }
  0xb8   :  { %v194_v55 = vmul.f32 %v534_v52, %v671_v3  ;;  %v536_v57 = vpop.eup %535 }
  0xb9   :  { %v538_v60 = vpop.eup %537  ;;  %v195_v62 = vmul.f32 %v536_v57, %v669_v2  ;;  %547 = vrsqrt.f32 %v170_v8 }
  0xba   :  { %v491_v58 = vpack.c.bf16 %v194_v55, %v193_v54  ;;  %v196_v63 = vmul.f32 %v538_v60, %v677_v6  ;;  %549 = vrsqrt.f32 %v169_v11  ;;  %v152_v2 = vpop.xlane.xlu1 %151  ;;  %v150_v19 = vpop.xlane.xlu0 %149 }
  0xbb   :  { %v540_v5 = vpop.eup %539  ;;  %v172_v23 = vmax.f32 %v152_v2, 1e-24  ;;  %v171_v24 = vmax.f32 %v150_v19, 1e-24 }
  0xbc   :  { %492 = vmatpush3.bf16.xpose.msra.mxu0 %v491_v58  ;;  %v542_v7 = vpop.eup %541  ;;  %v494_v3 = vpack.c.bf16 %v196_v63, %v195_v62  ;;  %v198_v15 = vmul.f32 %v540_v5, %v683_v9 }
  0xbd   :  { %493 = vmatprep.subr.bf16.mxu0 %v624_v33  ;;  %v197_v12 = vmul.f32 %v542_v7, %v685_v10  ;;  %551 = vrsqrt.f32 %v172_v23 }
  0xbe   :  { %553 = vrsqrt.f32 %v171_v24  ;;  %v156_v9 = vpop.xlane.xlu1 %155  ;;  %v154_v32 = vpop.xlane.xlu0 %153 }
  0xbf   :  { %v544_v16 = vpop.eup %543  ;;  %v497_v6 = vpack.c.bf16 %v198_v15, %v197_v12  ;;  %v174_v36 = vmax.f32 %v156_v9, 1e-24  ;;  %v173_v37 = vmax.f32 %v154_v32, 1e-24 }
  0xc0   :  { %v546_v20 = vpop.eup %545  ;;  %v200_v28 = vmul.f32 %v544_v16, %v691_v13 }
  0xc1   :  { %v199_v27 = vmul.f32 %v546_v20, %v693_v14  ;;  %555 = vrsqrt.f32 %v174_v36 }
  0xc2   :  { %557 = vrsqrt.f32 %v173_v37  ;;  %v160_v13 = vpop.xlane.xlu1 %159  ;;  %v158_v41 = vpop.xlane.xlu0 %157 }
  0xc3   :  { %v548_v10 = vpop.eup %547  ;;  %v500_v31 = vpack.c.bf16 %v200_v28, %v199_v27  ;;  %v176_v43 = vmax.f32 %v160_v13, 1e-24  ;;  %v175_v44 = vmax.f32 %v158_v41, 1e-24 }
  0xc4   :  { %495 = vmatpush3.bf16.xpose.msra.mxu0 %v494_v3  ;;  %v550_v34 = vpop.eup %549  ;;  %v202_v39 = vmul.f32 %v548_v10, %v699_v17 }
  0xc5   :  { %496 = vmatprep.subr.bf16.mxu0 %v624_v33  ;;  %v201_v38 = vmul.f32 %v550_v34, %v701_v18  ;;  %559 = vrsqrt.f32 %v176_v43 }
  0xc6   :  { %561 = vrsqrt.f32 %v175_v44  ;;  %v85_v48 = vpop.xlane.xlu0 %84  ;;  %v288_v58 = vpop.permute.xlu1 %287 }
  0xc7   :  { %v552_v14 = vpop.eup %551  ;;  %v503_v40 = vpack.c.bf16 %v202_v39, %v201_v38  ;;  %v86_v51 = vmax.f32 %v85_v48, 1e-24 }
  0xc8   :  { %v554_v42 = vpop.eup %553  ;;  %v204_v46 = vmul.f32 %v552_v14, %v707_v21 }
  0xc9   :  { %v203_v45 = vmul.f32 %v554_v42, %v709_v22  ;;  %563 = vrsqrt.f32 %v86_v51 }
  0xcb   :  { %v556_v17 = vpop.eup %555  ;;  %v506_v18 = vpack.c.bf16 %v204_v46, %v203_v45 }
  0xcc   :  { %498 = vmatpush3.bf16.xpose.msra.mxu0 %v497_v6  ;;  %v558_v47 = vpop.eup %557  ;;  %v206_v50 = vmul.f32 %v556_v17, %v715_v25  ;;  %v280_v25 = vlaneseq }
  0xcd   :  { %499 = vmatprep.subr.bf16.mxu0 %v624_v33  ;;  %v205_v49 = vmul.f32 %v558_v47, %v717_v26 }
  0xce   :  { %v762_v57 = vand.u32 127, %v280_v25  ;;  %v300_v63 = vpop.permute.xlu0 %299 }
  0xcf   :  { %v560_v52 = vpop.eup %559  ;;  %v509_v22 = vpack.c.bf16 %v206_v50, %v205_v49  ;;  %vm301_vm4 = vcmp.eq.s32.totalorder %v300_v63, 1 }
  0xd0   :  { %v562_v53 = vpop.eup %561  ;;  %v208_v54 = vmul.f32 %v560_v52, %v723_v29  ;;  %vm289_vm2 = vcmp.eq.s32.totalorder %v762_v57, %v288_v58  ;;  %vm295_vm3 = vcmp.lt.s32.totalorder %v762_v57, 16  ;;  %vm394_vm9 = vcmp.eq.s32.totalorder %v762_v57, 2 }
  0xd1   :  { %v207_v21 = vmul.f32 %v562_v53, %v725_v30  ;;  %v290_v30 = vsel %vm289_vm2, -32.0, %v628_v59  ;;  %vm302_vm5 = vmand %vm295_vm3, %vm301_vm4  ;;  %v432_v15 = vsel %vm289_vm2, 1.0, %v626_v35  ;;  %vm392_vm10 = vcmp.eq.s32.totalorder %v762_v57, 1 }
  0xd2   :  { %v320_v6 = vrot.slane %v432_v15, 4  ;;  %vm390_vm11 = vcmp.eq.s32.totalorder %v762_v57, 0 }
  0xd3   :  { %v512_v55 = vpack.c.bf16 %v208_v54, %v207_v21  ;;  %v564_v56 = vpop.eup %563 }
  0xd4   :  { %501 = vmatpush3.bf16.xpose.msra.mxu0 %v500_v31  ;;  %v88_v26 = vmul.f32 %v564_v56, %v665_v0  ;;  %v321_v27 = vmax.f32 %v432_v15, %v320_v6 }
  0xd5   :  { %502 = vmatprep.subr.bf16.mxu0 %v624_v33 }
  0xd6   :  { %v322_v31 = vrot.slane %v321_v27, 2 }
  0xd8   :  { %v323_v36 = vmax.f32 %v321_v27, %v322_v31 }
  0xda   :  { %v324_v14 = vrot.slane %v323_v36, 1 }
  0xdc   :  { %504 = vmatpush3.bf16.xpose.msra.mxu0 %v503_v40  ;;  %v325_v17 = vmax.f32 %v323_v36, %v324_v14 }
  0xdd   :  { %505 = vmatprep.subr.bf16.mxu0 %v624_v33 }
  0xde   :  { %v374_v48 = vsel %vm336_vm7, %v325_v17, 0.0 }
  0xe4   :  { %507 = vmatpush3.bf16.xpose.msra.mxu0 %v506_v18 }
  0xe5   :  { %508 = vmatprep.subr.bf16.mxu0 %v624_v33 }
  0xec   :  { %510 = vmatpush3.bf16.xpose.msra.mxu0 %v509_v22 }
  0xed   :  { %511 = vmatprep.subr.bf16.mxu0 %v624_v33 }
  0xf4   :  { %513 = vmatpush3.bf16.xpose.msra.mxu0 %v512_v55 }
  0xfb   :  { %488 = vmatmul.mubr.f32.vlgmr.msra.gmra.mrb[0].mxu0 %v88_v26 }
 0x1ce   :  { %v275_v60 = vpop.f32.mrb[0].mxu0 }
 0x1cf   :  { %v291_v29 = vmul.f32 %v290_v30, %v275_v60  ;;  %v489_v61 = vpop.f32.mrb[1].mxu0 }
 0x1d1   :  { %v292_v33 = vadd.f32 3.2, %v291_v29 }
 0x1d3   :  { %v293_v62 = vmul.f32 1.442695, %v292_v33 }
 0x1d5   :  { %565 = vpow2.f32 %v293_v62 }
 0x1df   :  { %v566_v0 = vpop.eup %565 }
 0x1e0   :  { %v303_v4 = vsel %vm302_vm5, %v566_v0, 0.0 }
 0x1e1   :  { %v304_v5 = vsel %vm289_vm2, %v303_v4, 0.0 }
 0x1e2   :  { %v305_v1 = vsub.f32 %v303_v4, %v304_v5  ;;  %v306_v7 = vrot.slane %v304_v5, 4 }
 0x1e4   :  { %v307_v3 = vadd.f32 %v306_v7, %v304_v5  ;;  %v312_v8 = vrot.slane %v305_v1, 4 }
 0x1e6   :  { %v308_v11 = vrot.slane %v307_v3, 2  ;;  %v313_v12 = vadd.f32 %v312_v8, %v305_v1 }
 0x1e8   :  { %v309_v2 = vadd.f32 %v308_v11, %v307_v3  ;;  %v314_v16 = vrot.slane %v313_v12, 2 }
 0x1ea   :  { %v310_v19 = vrot.slane %v309_v2, 1  ;;  %v315_v20 = vadd.f32 %v314_v16, %v313_v12 }
 0x1ec   :  { %v311_v23 = vadd.f32 %v310_v19, %v309_v2  ;;  %v316_v24 = vrot.slane %v315_v20, 1 }
 0x1ee   :  { %v317_v28 = vadd.f32 %v316_v24, %v315_v20  ;;  %v327_v9 = vadd.f32 1.0, %v311_v23  ;;  %v330_v32 = vmul.f32 -0.5, %v311_v23  ;;  %v333_v38 = vand.u32 2147483647, %v311_v23 }
 0x1f0   :  { %567 = vlog2.f32 %v327_v9  ;;  %v351_v10 = vadd.f32 1.0, %v317_v28  ;;  %v354_v34 = vmul.f32 -0.5, %v317_v28  ;;  %v331_v37 = vadd.f32 1.0, %v330_v32 }
 0x1f1   :  { %v357_v13 = vand.u32 2147483647, %v317_v28  ;;  %vm334_vm6 = vcmp.lt.f32.partialorder %v333_v38, 0.0004427343 }
 0x1f2   :  { %569 = vlog2.f32 %v351_v10  ;;  %v355_v35 = vadd.f32 1.0, %v354_v34  ;;  %v332_v41 = vmul.f32 %v331_v37, %v311_v23 }
 0x1f3   :  { %vm358_vm8 = vcmp.lt.f32.partialorder %v357_v13, 0.0004427343 }
 0x1f4   :  { %v356_v45 = vmul.f32 %v355_v35, %v317_v28 }
 0x1fa   :  { %v568_v39 = vpop.eup %567 }
 0x1fb   :  { %v329_v40 = vmul.f32 0.6931472, %v568_v39 }
 0x1fc   :  { %v570_v42 = vpop.eup %569 }
 0x1fd   :  { %v335_v43 = vsel %vm334_vm6, %v332_v41, %v329_v40  ;;  %v353_v44 = vmul.f32 0.6931472, %v570_v42 }
 0x1fe   :  { %v337_v46 = vsel %vm336_vm7, %v335_v43, 0.0 }
 0x1ff   :  { %338 = vadd.xlane.f32.xlu1 %v337_v46  ;;  %v359_v18 = vsel %vm358_vm8, %v356_v45, %v353_v44 }
 0x200   :  { %v360_v47 = vsel %vm336_vm7, %v359_v18, 0.0 }
 0x201   :  { %361 = vadd.xlane.f32.xlu0 %v360_v47 }
 0x203   :  { %375 = vadd.xlane.f32.xlu1 %v374_v48 }
 0x28c   :  { %v339_v49 = vpop.xlane.xlu1 %338 }
 0x28d   :  { %v340_v50 = vrot.slane %v339_v49, 4 }
 0x28e   :  { %v362_v51 = vpop.xlane.xlu0 %361 }
 0x28f   :  { %v341_v52 = vadd.f32 %v340_v50, %v339_v49  ;;  %v363_v22 = vrot.slane %v362_v51, 4 }
 0x290   :  { %v376_v53 = vpop.xlane.xlu1 %375 }
 0x291   :  { %v342_v21 = vrot.slane %v341_v52, 2  ;;  %v364_v54 = vadd.f32 %v363_v22, %v362_v51  ;;  %v377_v55 = vrot.slane %v376_v53, 4 }
 0x293   :  { %v365_v56 = vrot.slane %v364_v54, 2  ;;  %v378_v26 = vadd.f32 %v377_v55, %v376_v53  ;;  %v343_v25 = vadd.f32 %v342_v21, %v341_v52 }
 0x295   :  { %v366_v58 = vadd.f32 %v365_v56, %v364_v54  ;;  %v379_v59 = vrot.slane %v378_v26, 2  ;;  %v344_v30 = vrot.slane %v343_v25, 1 }
 0x297   :  { %v380_v60 = vadd.f32 %v379_v59, %v378_v26  ;;  %v345_v29 = vadd.f32 %v344_v30, %v343_v25  ;;  %v367_v61 = vrot.slane %v366_v58, 1 }
 0x299   :  { %514 = vpush %v345_v29  ;;  %v368_v33 = vadd.f32 %v367_v61, %v366_v58  ;;  %v381_v62 = vrot.slane %v380_v60, 1 }
 0x29b   :  { %516 = vpush %v368_v33  ;;  %v382_v63 = vadd.f32 %v381_v62, %v380_v60 }
 0x29d   :  { %518 = vpush %v382_v63 }
 0x2ca   :  { %s515_s1 = spop %514 }
 0x2cb   :  { %v400_v1 = vstv %s515_s1 }
 0x2cc   :  { %s517_s28 = spop %516 }
 0x2cd   :  { %v398_v4 = vstv %s517_s28 }
 0x2ce   :  { %s519_s29 = spop %518 }
 0x2cf   :  { %v396_v0 = vstv %s519_s29 }
 0x2d0   :  { %v397_v5 = vsel %vm394_vm9, %v396_v0, 0.0 }
 0x2d1   :  { %v399_v7 = vsel %vm392_vm10, %v398_v4, %v397_v5 }
 0x2d2   :  { %v401_v3 = vsel %vm390_vm11, %v400_v1, %v399_v7 }
 0x2d3   :  { %402 = vst [vmem:[#allocation8] sm:$0xff] %v401_v3 }
 0x2d4   :  { %604 = shalt.err (!%p601_p12)
}
 0x2d5   :  { %s605_s8 = scalar_lea.hbm %s791_s3, 128 }
 0x2d6   :  { %p606_p13 = scmp.ne.s32.totalorder %s791_s3, %s605_s8  ;;  %p609_p0 = scmp.lt.u32.totalorder %s605_s8, %s791_s3 }
 0x2d8   :  { %p611_p1 = pnand %p609_p0, %p606_p13 }
 0x2da   :  { %614 = shalt.err (!%p611_p1)
}
 0x2db   :  { %412 = dma.vmem_to_hbm [thread:$0]  %s410_s4, 128, %s791_s3, [#allocation7]  }
 0x2dc   :  { %619 = dma.done.wait [#allocation7], 128  }
 0x2dd   :  { %620 = vsyncadd [#allocation7], 4294967168 }
 0x2de   :  { %416 = vsyncpa [#allocation6], 1 }
 0x2df   :  { %417 = vsyncpa [#allocation7], 1 }
 0x2e0   :  { %418 = vsyncmov [#allocation4] }
 0x2e3   :  { %s419_s15 = vpop.sfrf %418 }
 0x2e4   :  { %p437_p2 = scmp.ne.s32.totalorder %s419_s15, 0 }
 0x2e6   :  { %423 = shalt.err (%p437_p2)  }

</bundles_post_ra>
